<compile_context>
chip_gen: v5e
topology: v5e:2x2
jax: 0.10.0
libtpu: 0.0.40
codegen_flags: <defaults>
</compile_context>

<pallas_src>
import jax
import jax.numpy as jnp
from jax.experimental import pallas as pl
from jax.experimental.pallas import tpu as pltpu


def _round_up(n, m):
    return ((n + m - 1) // m) * m


def _policy_kernel(x_ref, wT_ref, w46T_ref, aux_ref, out_ref):
    # x_ref    : (3, TB)    observations, batch on lanes
    # wT_ref   : (192, 64)  rows 0:64 = W2^T, rows 64:192 = [W3^T ; W5^T]
    # w46T_ref : (2, 128)   row 0 = [w4^T | 0], row 1 = [0 | w6^T]
    # aux_ref  : (128, 8)   cols 0..2 = W1 rows (as feature columns),
    #                       3 = b1, 4 = b2, 5 = [b3 ; b5], 6 = [b4, b6, 0...]
    # out_ref  : (2, TB)    row 0 = m, row 1 = v   (lane-dense stores)
    x0 = x_ref[0:1, :]                                   # (1, TB)
    x1 = x_ref[1:2, :]
    x2 = x_ref[2:3, :]

    w1x0 = aux_ref[0:64, 0:1]                            # (64, 1)
    w1x1 = aux_ref[0:64, 1:2]
    w1x2 = aux_ref[0:64, 2:3]
    b1 = aux_ref[0:64, 3:4]
    b2 = aux_ref[0:64, 4:5]
    b35 = aux_ref[:, 5:6]                                # (128, 1)
    b46 = aux_ref[0:2, 6:7]                              # (2, 1)

    # Layer 1 on the VPU: three outer-product broadcast MACs (a K=3 contraction
    # would waste a full MXU pass).
    h1 = jnp.maximum(w1x0 * x0 + w1x1 * x1 + w1x2 * x2 + b1, 0.0)        # (64, TB)

    # Layer 2 (shared trunk): (64,64) @ (64,TB).
    h2 = jnp.maximum(
        jnp.dot(wT_ref[0:64, :], h1, preferred_element_type=jnp.float32) + b2,
        0.0)                                                              # (64, TB)

    # Fused branch hidden: [W3^T ; W5^T] @ h2 -> (128, TB), lane-dense.
    h35 = jnp.maximum(
        jnp.dot(wT_ref[64:192, :], h2, preferred_element_type=jnp.float32) + b35,
        0.0)                                                              # (128, TB)

    # Fused block-diagonal head: (2,128) @ (128,TB) -> (2,TB).
    out = jnp.dot(w46T_ref[...], h35, preferred_element_type=jnp.float32) + b46

    # Row 0 = mean, row 1 = variance (exp applied only where needed).
    out_ref[0:1, :] = out[0:1, :]
    out_ref[1:2, :] = jnp.exp(out[1:2, :])


def pack_params(params):
    """Pack the 12 PyTorch-style tensors into 3 DMA-friendly transposed slabs.

    In an RL loop, call this once and reuse the packed dict across steps.
    """
    f32 = jnp.float32
    w2T = params["w2"].astype(f32).T                                       # (64, 64)
    w35T = jnp.concatenate(
        [params["w3"].astype(f32).T, params["w5"].astype(f32).T], axis=0)  # (128, 64)
    wT_slab = jnp.concatenate([w2T, w35T], axis=0)                         # (192, 64)

    w46T = (jnp.zeros((2, 128), f32)
            .at[0, :64].set(params["w4"][:, 0].astype(f32))
            .at[1, 64:].set(params["w6"][:, 0].astype(f32)))               # (2, 128)

    aux = jnp.zeros((128, 8), f32)
    aux = aux.at[:64, 0].set(params["w1"][0].astype(f32))
    aux = aux.at[:64, 1].set(params["w1"][1].astype(f32))
    aux = aux.at[:64, 2].set(params["w1"][2].astype(f32))
    aux = aux.at[:64, 3].set(params["b1"][0].astype(f32))
    aux = aux.at[:64, 4].set(params["b2"][0].astype(f32))
    aux = aux.at[:64, 5].set(params["b3"][0].astype(f32))
    aux = aux.at[64:, 5].set(params["b5"][0].astype(f32))
    aux = aux.at[0, 6].set(params["b4"][0, 0].astype(f32))
    aux = aux.at[1, 6].set(params["b6"][0, 0].astype(f32))
    return {"wT_slab": wT_slab, "w46T": w46T, "aux": aux}


def policy_net_forward(x, packed, *, batch_tile=None):
    """x: (B, 3) float32; packed: output of pack_params. Returns (m, v), each (B, 1)."""
    B = x.shape[0]
    xT = x.astype(jnp.float32).T                       # (3, B): batch on lanes

    b128 = _round_up(B, 128)                           # lane-dense minimum
    if batch_tile is None:
        # Default: split into (up to) 2 tiles so both v7x TensorCores get work under
        # dimension_semantics=("parallel",); cap at 4096 lanes/tile. VMEM footprint
        # (x/out tiles + 3 resident weight slabs + intermediates) stays well under
        # every generation's scoped VMEM even at the cap. On v5e/v6e a single big
        # tile is marginally better for small batches: pass batch_tile=B to force it.
        tb = min(4096, max(128, _round_up(pl.cdiv(b128, 2), 128)))
    else:
        # Clamp to a multiple of 128 so the lane-dense (.., tb) blocks satisfy the
        # (8,128) BlockSpec constraint.
        tb = max(128, _round_up(min(batch_tile, b128), 128))
    b_pad = _round_up(B, tb)
    if b_pad != B:
        xT = jnp.pad(xT, ((0, 0), (0, b_pad - B)))     # padded lanes stay finite (no exp blowup)
    grid = (b_pad // tb,)

    out = pl.pallas_call(
        _policy_kernel,
        out_shape=jax.ShapeDtypeStruct((2, b_pad), jnp.float32),
        grid_spec=pltpu.PrefetchScalarGridSpec(
            num_scalar_prefetch=0,
            grid=grid,
            in_specs=[
                pl.BlockSpec((3, tb), lambda i: (0, i)),      # lane-dense obs tile
                pl.BlockSpec((192, 64), lambda i: (0, 0)),    # weights stay resident
                pl.BlockSpec((2, 128), lambda i: (0, 0)),
                pl.BlockSpec((128, 8), lambda i: (0, 0)),
            ],
            out_specs=pl.BlockSpec((2, tb), lambda i: (0, i)),  # lane-dense output tile
        ),
        compiler_params=pltpu.CompilerParams(
            dimension_semantics=("parallel",)),                 # megacore on v7x
    )(xT, packed["wT_slab"], packed["w46T"], packed["aux"])

    m = out[0, :B].reshape(B, 1)
    v = out[1, :B].reshape(B, 1)
    return m, v


def init_params(key):
    """Deterministic init matching PyTorch nn.Linear shapes (stored transposed: (in, out))."""
    dims = [("w1", 3, 64), ("w2", 64, 64), ("w3", 64, 64),
            ("w4", 64, 1), ("w5", 64, 64), ("w6", 64, 1)]
    params = {}
    keys = jax.random.split(key, len(dims))
    for k, (name, fan_in, fan_out) in zip(keys, dims):
        kw, kb = jax.random.split(k)
        bound = 1.0 / (fan_in ** 0.5)  # PyTorch default uniform(-1/sqrt(fan_in), ...)
        params[name] = jax.random.uniform(
            kw, (fan_in, fan_out), jnp.float32, -bound, bound)
        params["b" + name[1:]] = jax.random.uniform(
            kb, (1, fan_out), jnp.float32, -bound, bound)
    return params


def reference_forward(x, params):
    h = jax.nn.relu(x @ params["w1"] + params["b1"])
    h = jax.nn.relu(h @ params["w2"] + params["b2"])
    m = jax.nn.relu(h @ params["w3"] + params["b3"]) @ params["w4"] + params["b4"]
    v = jnp.exp(jax.nn.relu(h @ params["w5"] + params["b5"]) @ params["w6"]
                + params["b6"])
    return m, v


if __name__ == "__main__":
    key = jax.random.PRNGKey(0)
    pkey, xkey, xkey2 = jax.random.split(key, 3)
    params = init_params(pkey)
    packed = pack_params(params)

    # Small pendulum-style batch (obs dim = 3), default tiling (single 128-lane tile).
    batch = 8
    x = jax.random.normal(xkey, (batch, 3), jnp.float32)

    m, v = policy_net_forward(x, packed)
    jax.block_until_ready((m, v))

    m_ref, v_ref = reference_forward(x, params)
    assert m.shape == (batch, 1) and v.shape == (batch, 1)
    assert jnp.allclose(m, m_ref, atol=1e-5, rtol=1e-5)
    assert jnp.allclose(v, v_ref, atol=1e-5, rtol=1e-5)

    # Exercise the multi-tile gridded path + lane padding (B not a multiple of 128).
    x2 = jax.random.normal(xkey2, (300, 3), jnp.float32)
    m2, v2 = policy_net_forward(x2, packed, batch_tile=128)   # grid = (3,), b_pad = 384
    jax.block_until_ready((m2, v2))
    m2_ref, v2_ref = reference_forward(x2, params)
    assert m2.shape == (300, 1) and v2.shape == (300, 1)
    assert jnp.allclose(m2, m2_ref, atol=1e-5, rtol=1e-5)
    assert jnp.allclose(v2, v2_ref, atol=1e-5, rtol=1e-5)

    print("KERNEL_OK")
</pallas_src>

<mosaic_0001>
module attributes {stable_mosaic.version = 11 : i64} {
  func.func @_policy_kernel(%arg0: i32, %arg1: memref<3x128xf32, #tpu.memory_space<vmem>>, %arg2: memref<192x64xf32, #tpu.memory_space<vmem>>, %arg3: memref<2x128xf32, #tpu.memory_space<vmem>>, %arg4: memref<128x8xf32, #tpu.memory_space<vmem>>, %arg5: memref<2x128xf32, #tpu.memory_space<vmem>>) attributes {dimension_semantics = [#tpu.dimension_semantics<parallel>], iteration_bounds = array<i64: 1>, scalar_prefetch = 0 : i64, scratch_operands = 0 : i64, tpu.core_type = #tpu.core_type<tc>, window_params = [{transform_indices = @transform_0, window_bounds = array<i64: 3, 128>}, {pipeline_mode = #tpu.pipeline_mode<synchronous>, transform_indices = @transform_1, window_bounds = array<i64: 192, 64>}, {pipeline_mode = #tpu.pipeline_mode<synchronous>, transform_indices = @transform_2, window_bounds = array<i64: 2, 128>}, {pipeline_mode = #tpu.pipeline_mode<synchronous>, transform_indices = @transform_3, window_bounds = array<i64: 128, 8>}, {transform_indices = @transform_4, window_bounds = array<i64: 2, 128>}]} {
    %c0 = arith.constant 0 : index
    %c0_0 = arith.constant 0 : index
    %0 = vector.load %arg1[%c0, %c0_0] : memref<3x128xf32, #tpu.memory_space<vmem>>, vector<1x128xf32>
    %c1 = arith.constant 1 : index
    %c0_1 = arith.constant 0 : index
    %1 = vector.load %arg1[%c1, %c0_1] : memref<3x128xf32, #tpu.memory_space<vmem>>, vector<1x128xf32>
    %c2 = arith.constant 2 : index
    %c0_2 = arith.constant 0 : index
    %2 = vector.load %arg1[%c2, %c0_2] : memref<3x128xf32, #tpu.memory_space<vmem>>, vector<1x128xf32>
    %c0_3 = arith.constant 0 : index
    %c0_4 = arith.constant 0 : index
    %3 = vector.load %arg4[%c0_3, %c0_4] : memref<128x8xf32, #tpu.memory_space<vmem>>, vector<64x1xf32>
    %c0_5 = arith.constant 0 : index
    %c1_6 = arith.constant 1 : index
    %4 = vector.load %arg4[%c0_5, %c1_6] : memref<128x8xf32, #tpu.memory_space<vmem>>, vector<64x1xf32>
    %c0_7 = arith.constant 0 : index
    %c2_8 = arith.constant 2 : index
    %5 = vector.load %arg4[%c0_7, %c2_8] : memref<128x8xf32, #tpu.memory_space<vmem>>, vector<64x1xf32>
    %c0_9 = arith.constant 0 : index
    %c3 = arith.constant 3 : index
    %6 = vector.load %arg4[%c0_9, %c3] : memref<128x8xf32, #tpu.memory_space<vmem>>, vector<64x1xf32>
    %c0_10 = arith.constant 0 : index
    %c4 = arith.constant 4 : index
    %7 = vector.load %arg4[%c0_10, %c4] : memref<128x8xf32, #tpu.memory_space<vmem>>, vector<64x1xf32>
    %c0_11 = arith.constant 0 : index
    %c5 = arith.constant 5 : index
    %8 = vector.load %arg4[%c0_11, %c5] : memref<128x8xf32, #tpu.memory_space<vmem>>, vector<128x1xf32>
    %c0_12 = arith.constant 0 : index
    %c6 = arith.constant 6 : index
    %9 = vector.load %arg4[%c0_12, %c6] : memref<128x8xf32, #tpu.memory_space<vmem>>, vector<2x1xf32>
    %10 = vector.broadcast %3 : vector<64x1xf32> to vector<64x128xf32>
    %11 = vector.broadcast %0 : vector<1x128xf32> to vector<64x128xf32>
    %12 = arith.mulf %10, %11 : vector<64x128xf32>
    %13 = vector.broadcast %4 : vector<64x1xf32> to vector<64x128xf32>
    %14 = vector.broadcast %1 : vector<1x128xf32> to vector<64x128xf32>
    %15 = arith.mulf %13, %14 : vector<64x128xf32>
    %16 = arith.addf %12, %15 : vector<64x128xf32>
    %17 = vector.broadcast %5 : vector<64x1xf32> to vector<64x128xf32>
    %18 = vector.broadcast %2 : vector<1x128xf32> to vector<64x128xf32>
    %19 = arith.mulf %17, %18 : vector<64x128xf32>
    %20 = arith.addf %16, %19 : vector<64x128xf32>
    %21 = vector.broadcast %6 : vector<64x1xf32> to vector<64x128xf32>
    %22 = arith.addf %20, %21 : vector<64x128xf32>
    %cst = arith.constant 0.000000e+00 : f32
    %23 = vector.broadcast %cst : f32 to vector<64x128xf32>
    %24 = arith.maximumf %22, %23 : vector<64x128xf32>
    %c0_13 = arith.constant 0 : index
    %c0_14 = arith.constant 0 : index
    %25 = vector.load %arg2[%c0_13, %c0_14] : memref<192x64xf32, #tpu.memory_space<vmem>>, vector<64x64xf32>
    %cst_15 = arith.constant dense<0.000000e+00> : vector<64x128xf32>
    %26 = tpu.matmul %25, %24, %cst_15 {dimension_numbers = #tpu.dot_dimension_numbers<[1], [0], [0], [1], [0, 0, 1, 1], [], []>} : vector<64x64xf32>, vector<64x128xf32>, vector<64x128xf32> -> vector<64x128xf32>
    %27 = vector.broadcast %7 : vector<64x1xf32> to vector<64x128xf32>
    %28 = arith.addf %26, %27 : vector<64x128xf32>
    %cst_16 = arith.constant 0.000000e+00 : f32
    %29 = vector.broadcast %cst_16 : f32 to vector<64x128xf32>
    %30 = arith.maximumf %28, %29 : vector<64x128xf32>
    %c64 = arith.constant 64 : index
    %c0_17 = arith.constant 0 : index
    %31 = vector.load %arg2[%c64, %c0_17] : memref<192x64xf32, #tpu.memory_space<vmem>>, vector<128x64xf32>
    %cst_18 = arith.constant dense<0.000000e+00> : vector<128x128xf32>
    %32 = tpu.matmul %31, %30, %cst_18 {dimension_numbers = #tpu.dot_dimension_numbers<[1], [0], [0], [1], [0, 0, 1, 1], [], []>} : vector<128x64xf32>, vector<64x128xf32>, vector<128x128xf32> -> vector<128x128xf32>
    %33 = vector.broadcast %8 : vector<128x1xf32> to vector<128x128xf32>
    %34 = arith.addf %32, %33 : vector<128x128xf32>
    %cst_19 = arith.constant 0.000000e+00 : f32
    %35 = vector.broadcast %cst_19 : f32 to vector<128x128xf32>
    %36 = arith.maximumf %34, %35 : vector<128x128xf32>
    %c0_20 = arith.constant 0 : index
    %c0_21 = arith.constant 0 : index
    %37 = vector.load %arg3[%c0_20, %c0_21] : memref<2x128xf32, #tpu.memory_space<vmem>>, vector<2x128xf32>
    %cst_22 = arith.constant dense<0.000000e+00> : vector<2x128xf32>
    %38 = tpu.matmul %37, %36, %cst_22 {dimension_numbers = #tpu.dot_dimension_numbers<[1], [0], [0], [1], [0, 0, 1, 1], [], []>} : vector<2x128xf32>, vector<128x128xf32>, vector<2x128xf32> -> vector<2x128xf32>
    %39 = vector.broadcast %9 : vector<2x1xf32> to vector<2x128xf32>
    %40 = arith.addf %38, %39 : vector<2x128xf32>
    %41 = vector.extract_strided_slice %40 {offsets = [0, 0], sizes = [1, 128], strides = [1, 1]} : vector<2x128xf32> to vector<1x128xf32>
    %c0_23 = arith.constant 0 : index
    %c0_24 = arith.constant 0 : index
    %42 = vector.load %arg5[%c0_23, %c0_24] : memref<2x128xf32, #tpu.memory_space<vmem>>, vector<1x128xf32>
    tpu.vector_store %arg5[%c0_23, %c0_24], %41 {strides = array<i32>} : memref<2x128xf32, #tpu.memory_space<vmem>>, vector<1x128xf32>,
    %43 = vector.extract_strided_slice %40 {offsets = [1, 0], sizes = [1, 128], strides = [1, 1]} : vector<2x128xf32> to vector<1x128xf32>
    %44 = math.exp %43 : vector<1x128xf32>
    %c1_25 = arith.constant 1 : index
    %c0_26 = arith.constant 0 : index
    %45 = vector.load %arg5[%c1_25, %c0_26] : memref<2x128xf32, #tpu.memory_space<vmem>>, vector<1x128xf32>
    tpu.vector_store %arg5[%c1_25, %c0_26], %44 {strides = array<i32>} : memref<2x128xf32, #tpu.memory_space<vmem>>, vector<1x128xf32>,
    return
  }
  func.func @transform_0(%arg0: i32) -> (i32, i32) {
    %c0_i32 = arith.constant 0 : i32
    %c0_i32_0 = arith.constant 0 : i32
    return %c0_i32, %arg0 : i32, i32
  }
  func.func @transform_1(%arg0: i32) -> (i32, i32) {
    %c0_i32 = arith.constant 0 : i32
    %c0_i32_0 = arith.constant 0 : i32
    %c0_i32_1 = arith.constant 0 : i32
    return %c0_i32, %c0_i32_0 : i32, i32
  }
  func.func @transform_2(%arg0: i32) -> (i32, i32) {
    %c0_i32 = arith.constant 0 : i32
    %c0_i32_0 = arith.constant 0 : i32
    %c0_i32_1 = arith.constant 0 : i32
    return %c0_i32, %c0_i32_0 : i32, i32
  }
  func.func @transform_3(%arg0: i32) -> (i32, i32) {
    %c0_i32 = arith.constant 0 : i32
    %c0_i32_0 = arith.constant 0 : i32
    %c0_i32_1 = arith.constant 0 : i32
    return %c0_i32, %c0_i32_0 : i32, i32
  }
  func.func @transform_4(%arg0: i32) -> (i32, i32) {
    %c0_i32 = arith.constant 0 : i32
    %c0_i32_0 = arith.constant 0 : i32
    return %c0_i32, %arg0 : i32, i32
  }
}

</mosaic_0001>

<bundles_post_ra>
// kernel: tpu_custom_call.1
= control target key start
LH: loop header
LB: loop body
LE: loop exit
PB: predicated region body
PF: predicated region fallthrough
CT: control target
= control target key end

     0   :  { %v713_v2 = vmov 2   ;;  %v714_v3 = vmov 0   ;;  %s1011_s0 = inlined_call_operand.vmem [shape: f32[3,128], index: 0, kind: input, shape index: {}]   ;;  %s1012_s1 = inlined_call_operand.vmem [shape: f32[192,64], index: 1, kind: input, shape index: {}]   ;;  %s1013_s2 = inlined_call_operand.vmem [shape: f32[2,128], index: 2, kind: input, shape index: {}]   ;;  %s1014_s3 = inlined_call_operand.vmem [shape: f32[128,8], index: 3, kind: input, shape index: {}]   ;;  %s1015_s4 = inlined_call_operand.hbm [shape: f32[2,128], index: 4, kind: output, shape index: {}]  }
   0x1   :  { %v749_v0 = vld [vmem:[%s1014_s3 + $0x38] sm:$0xff]  ;;  %v754_v1 = vld [vmem:[%s1014_s3 + $0x30] sm:$0xff]  ;;  %653 = vset.pattern.permute.xlu2 %v713_v2  ;;  %651 = vset.pattern.permute.xlu1 %v714_v3 }
   0x2   :  { %650 = vset.pattern.permute.xlu0 %v714_v3  ;;  %165 = vperm.xlu2 %653, %v749_v0  }
   0x3   :  { %9 = vsyncpa [#allocation3], 0  ;;  %75 = vperm.xlu0 %650, %v749_v0   ;;  %70 = vperm.xlu1 %651, %v754_v1   ;;  %v762_v4 = vld [vmem:[%s1014_s3 + $0x20] sm:$0xff]  ;;  %v767_v5 = vld [vmem:[%s1014_s3 + $0x28] sm:$0xff]  ;;  %v715_v6 = vmov 1   ;;  %v716_v8 = vmov 3  }
   0x4   :  { %v778_v7 = vld [vmem:[%s1014_s3 + $0x18] sm:$0xff]  ;;  %v792_v9 = vld [vmem:[%s1014_s3 + $0x10] sm:$0xff]  ;;  %v797_v10 = vld [vmem:[%s1014_s3] sm:$0xff]  ;;  %vm273_vm0 = vcmask 523264   ;;  %s720_s22 = smov [#allocation2]   ;;  %s601_s26 = sshll.u32 %s1015_s4, 4  ;;  %s602_s26 = int_to_ptr.hbm [resolvable:$true] %s601_s26 }
   0x5   :  { %v805_v11 = vld [vmem:[%s1014_s3 + $0x8] sm:$0xff]  ;;  %v821_v22 = vld [vmem:[%s1011_s0 + $0x1] ss:$0 sm:$0xff]  ;;  %v826_v25 = vld [vmem:[%s1011_s0] ss:$0 sm:$0xff]  ;;  %s599_s23 = sshll.u32 %s720_s22, 4  ;;  %s600_s23 = int_to_ptr.vmem [resolvable:$true] %s599_s23 }
   0x6   :  { %v834_v30 = vld [vmem:[%s1011_s0 + $0x2] ss:$0 sm:$0xff] }
   0xa   :  { %654 = vset.pattern.permute.xlu2 %v714_v3 }
   0xb   :  { %652 = vset.pattern.permute.xlu1 %v715_v6  ;;  %60 = vperm.xlu0 %650, %v762_v4  }
   0xc   :  { %112 = vperm.xlu1 %652, %v754_v1   ;;  %65 = vperm.xlu2 %654, %v767_v5  }
  0x13   :  { %656 = vset.pattern.permute.xlu0 %v715_v6 }
  0x14   :  { %108 = vperm.xlu1 %652, %v767_v5   ;;  %655 = vset.pattern.permute.xlu2 %v713_v2 }
  0x15   :  { %116 = vperm.xlu0 %656, %v749_v0   ;;  %161 = vperm.xlu2 %655, %v754_v1  }
  0x1c   :  { %104 = vperm.xlu1 %652, %v762_v4  }
  0x1d   :  { %100 = vperm.xlu0 %656, %v778_v7   ;;  %157 = vperm.xlu2 %655, %v767_v5  }
  0x24   :  { %657 = vset.pattern.permute.xlu1 %v716_v8 }
  0x25   :  { %667 = vset.pattern.permute.xlu0 %v716_v8  ;;  %658 = vset.pattern.permute.xlu2 %v714_v3 }
  0x26   :  { %214 = vperm.xlu1 %657, %v749_v0   ;;  %202 = vperm.xlu0 %667, %v762_v4  }
  0x27   :  { %55 = vperm.xlu2 %658, %v778_v7  }
  0x2e   :  { %659 = vset.pattern.permute.xlu1 %v713_v2  ;;  %668 = vset.pattern.permute.xlu0 %v713_v2 }
  0x2f   :  { %153 = vperm.xlu1 %659, %v762_v4   ;;  %149 = vperm.xlu0 %668, %v778_v7  }
  0x30   :  { %660 = vset.pattern.permute.xlu2 %v716_v8 }
  0x31   :  { %210 = vperm.xlu2 %660, %v754_v1  }
  0x37   :  { %661 = vset.pattern.permute.xlu1 %v714_v3  ;;  %137 = vperm.xlu0 %668, %v797_v10  }
  0x38   :  { %50 = vperm.xlu1 %661, %v792_v9  }
  0x39   :  { %662 = vset.pattern.permute.xlu2 %v715_v6 }
  0x3a   :  { %96 = vperm.xlu2 %662, %v792_v9  }
  0x40   :  { %663 = vset.pattern.permute.xlu1 %v716_v8 }
  0x41   :  { %206 = vperm.xlu1 %663, %v767_v5  }
  0x42   :  { %664 = vset.pattern.permute.xlu2 %v714_v3 }
  0x43   :  { %45 = vperm.xlu2 %664, %v805_v11  }
  0x49   :  { %665 = vset.pattern.permute.xlu1 %v715_v6 }
  0x4a   :  { %92 = vperm.xlu1 %665, %v805_v11  }
  0x4b   :  { %666 = vset.pattern.permute.xlu2 %v713_v2 }
  0x4c   :  { %145 = vperm.xlu2 %666, %v792_v9  }
  0x52   :  { %669 = vset.pattern.permute.xlu1 %v714_v3 }
  0x53   :  { %40 = vperm.xlu1 %669, %v797_v10  }
  0x54   :  { %670 = vset.pattern.permute.xlu2 %v715_v6 }
  0x55   :  { %88 = vperm.xlu2 %670, %v797_v10  }
  0x5b   :  { %671 = vset.pattern.permute.xlu1 %v713_v2 }
  0x5c   :  { %141 = vperm.xlu1 %671, %v805_v11   ;;  %v166_v12 = vpop.permute.xlu2 %165 }
  0x5d   :  { %672 = vset.pattern.permute.xlu2 %v716_v8  ;;  %v176_v36 = vmul.f32 %v834_v30, %v166_v12 }
  0x5e   :  { %198 = vperm.xlu2 %672, %v778_v7  }
  0x64   :  { %673 = vset.pattern.permute.xlu1 %v716_v8 }
  0x65   :  { %194 = vperm.xlu1 %673, %v792_v9  }
  0x66   :  { %v66_v13 = vpop.permute.xlu2 %65  ;;  %190 = vperm.xlu2 %672, %v805_v11  }
  0x67   :  { %v84_v53 = vmul.f32 %v826_v25, %v66_v13 }
  0x6d   :  { %186 = vperm.xlu1 %673, %v797_v10  }
  0x6f   :  { %v162_v14 = vpop.permute.xlu2 %161 }
  0x70   :  { %v175_v32 = vmul.f32 %v834_v30, %v162_v14 }
  0x75   :  { %v71_v15 = vpop.permute.xlu1 %70  ;;  %v76_v16 = vpop.permute.xlu0 %75 }
  0x76   :  { %v86_v27 = vmul.f32 %v826_v25, %v76_v16  ;;  %v85_v31 = vmul.f32 %v826_v25, %v71_v15 }
  0x77   :  { %v158_v17 = vpop.permute.xlu2 %157 }
  0x78   :  { %v174_v55 = vmul.f32 %v834_v30, %v158_v17 }
  0x7d   :  { %v61_v19 = vpop.permute.xlu0 %60 }
  0x7e   :  { %v113_v18 = vpop.permute.xlu1 %112  ;;  %v83_v49 = vmul.f32 %v826_v25, %v61_v19 }
  0x7f   :  { %v126_v28 = vmul.f32 %v821_v22, %v113_v18 }
  0x81   :  { %v56_v20 = vpop.permute.xlu2 %55  ;;  %v134_v33 = vadd.f32 %v126_v28, %v85_v31 }
  0x82   :  { %v82_v58 = vmul.f32 %v826_v25, %v56_v20  ;;  %v717_v20 = vmov 4  }
  0x83   :  { %v183_v37 = vadd.f32 %v175_v32, %v134_v33  ;;  %676 = vset.pattern.permute.xlu1 %v717_v20  ;;  %675 = vset.pattern.permute.xlu0 %v717_v20 }
  0x84   :  { %262 = vperm.xlu1 %676, %v767_v5   ;;  %266 = vperm.xlu0 %675, %v754_v1  }
  0x85   :  { %674 = vset.pattern.permute.xlu2 %v717_v20  ;;  %v32_v20 = vld [vmem:[%s1014_s3 + $0x58] sm:$0xff] }
  0x86   :  { %v109_v21 = vpop.permute.xlu1 %108  ;;  %270 = vperm.xlu2 %674, %v749_v0  }
  0x87   :  { %v117_v23 = vpop.permute.xlu0 %116  ;;  %v125_v50 = vmul.f32 %v821_v22, %v109_v21 }
  0x88   :  { %v127_v29 = vmul.f32 %v821_v22, %v117_v23 }
  0x89   :  { %v133_v56 = vadd.f32 %v125_v50, %v84_v53  ;;  %v238_v53 = vld [vmem:[%s1012_s1 + $0x28] sm:$0xff] }
  0x8a   :  { %v135_v34 = vadd.f32 %v127_v29, %v86_v27 }
  0x8b   :  { %v211_v24 = vpop.permute.xlu2 %210  ;;  %v182_v63 = vadd.f32 %v174_v55, %v133_v56  ;;  %v240_v55 = vld [vmem:[%s1012_s1 + $0x38] sm:$0xff] }
  0x8c   :  { %v184_v38 = vadd.f32 %v176_v36, %v135_v34  ;;  %v223_v40 = vadd.f32 %v211_v24, %v183_v37  ;;  %254 = vperm.xlu1 %676, %v778_v7   ;;  %246 = vperm.xlu0 %675, %v805_v11  }
  0x8e   :  { %v105_v26 = vpop.permute.xlu1 %104  ;;  %v231_v44 = vmax.f32 %v223_v40, 0.0  ;;  %258 = vperm.xlu2 %674, %v762_v4  }
  0x8f   :  { %v101_v43 = vpop.permute.xlu0 %100  ;;  %v124_v51 = vmul.f32 %v821_v22, %v105_v26 }
  0x90   :  { %v123_v59 = vmul.f32 %v821_v22, %v101_v43 }
  0x91   :  { %v132_v57 = vadd.f32 %v124_v51, %v83_v49  ;;  %v236_v51 = vld [vmem:[%s1012_s1 + $0x18] sm:$0xff] }
  0x92   :  { %v131_v2 = vadd.f32 %v123_v59, %v82_v58 }
  0x94   :  { %v97_v35 = vpop.permute.xlu2 %96  ;;  %242 = vperm.xlu1 %676, %v797_v10  }
  0x95   :  { %v122_v23 = vmul.f32 %v821_v22, %v97_v35 }
  0x96   :  { %250 = vperm.xlu2 %674, %v792_v9  }
  0x98   :  { %v215_v39 = vpop.permute.xlu1 %214  ;;  %v203_v47 = vpop.permute.xlu0 %202 }
  0x99   :  { %v224_v41 = vadd.f32 %v215_v39, %v184_v38 }
  0x9b   :  { %v232_v42 = vmax.f32 %v224_v41, 0.0 }
  0x9d   :  { %306 = vmatpush.msra.mxu0 %v232_v42  ;;  %v46_v45 = vpop.permute.xlu2 %45 }
  0x9e   :  { %v80_v28 = vmul.f32 %v826_v25, %v46_v45 }
  0x9f   :  { %307 = vmatpush.msra.mxu0 %v231_v44 }
  0xa1   :  { %v154_v46 = vpop.permute.xlu1 %153  ;;  %v150_v62 = vpop.permute.xlu0 %149 }
  0xa2   :  { %v173_v54 = vmul.f32 %v834_v30, %v154_v46  ;;  %v172_v3 = vmul.f32 %v834_v30, %v150_v62 }
  0xa4   :  { %v181_v61 = vadd.f32 %v173_v54, %v132_v57  ;;  %v180_v14 = vadd.f32 %v172_v3, %v131_v2  ;;  %v239_v54 = vld [vmem:[%s1012_s1 + $0x30] sm:$0xff] }
  0xa6   :  { %v146_v48 = vpop.permute.xlu2 %145  ;;  %v221_v12 = vadd.f32 %v203_v47, %v181_v61 }
  0xa7   :  { %v171_v31 = vmul.f32 %v834_v30, %v146_v48 }
  0xa8   :  { %v229_v16 = vmax.f32 %v221_v12, 0.0 }
  0xa9   :  { %v138_v39 = vpop.permute.xlu0 %137 }
  0xaa   :  { %v51_v52 = vpop.permute.xlu1 %50  ;;  %v169_v44 = vmul.f32 %v834_v30, %v138_v39 }
  0xab   :  { %v81_v24 = vmul.f32 %v826_v25, %v51_v52  ;;  %v237_v52 = vld [vmem:[%s1012_s1 + $0x20] sm:$0xff] }
  0xad   :  { %v130_v32 = vadd.f32 %v122_v23, %v81_v24  ;;  %v35_v24 = vld [vmem:[%s1014_s3 + $0x70] sm:$0xff] }
  0xaf   :  { %v89_v60 = vpop.permute.xlu2 %88  ;;  %v179_v38 = vadd.f32 %v171_v31, %v130_v32 }
  0xb0   :  { %v120_v35 = vmul.f32 %v821_v22, %v89_v60 }
  0xb3   :  { %v207_v6 = vpop.permute.xlu1 %206 }
  0xb4   :  { %v222_v8 = vadd.f32 %v207_v6, %v182_v63  ;;  %v718_v63 = vmov 5  }
  0xb5   :  { %679 = vset.pattern.permute.xlu1 %v718_v63  ;;  %677 = vset.pattern.permute.xlu2 %v718_v63 }
  0xb6   :  { %v230_v13 = vmax.f32 %v222_v8, 0.0  ;;  %678 = vset.pattern.permute.xlu0 %v718_v63  ;;  %v34_v8 = vld [vmem:[%s1014_s3 + $0x68] sm:$0xff] }
  0xb7   :  { %422 = vperm.xlu1 %679, %v34_v8   ;;  %427 = vperm.xlu0 %678, %v35_v24   ;;  %v719_v24 = vmov 6  }
  0xb8   :  { %v199_v15 = vpop.permute.xlu2 %198  ;;  %308 = vmatpush.msra.mxu0 %v230_v13 }
  0xb9   :  { %v220_v17 = vadd.f32 %v199_v15, %v180_v14 }
  0xba   :  { %309 = vmatpush.msra.mxu0 %v229_v16 }
  0xbb   :  { %v228_v18 = vmax.f32 %v220_v17, 0.0 }
  0xbc   :  { %v93_v19 = vpop.permute.xlu1 %92 }
  0xbd   :  { %310 = vmatpush.msra.mxu0 %v228_v18  ;;  %v121_v26 = vmul.f32 %v821_v22, %v93_v19  ;;  %v233_v22 = vld [vmem:[%s1012_s1] sm:$0xff]  ;;  %v36_v19 = vld [vmem:[%s1014_s3 + $0x78] sm:$0xff] }
  0xbe   :  { %432 = vperm.xlu2 %677, %v36_v19  }
  0xbf   :  { %v129_v33 = vadd.f32 %v121_v26, %v80_v28  ;;  %412 = vperm.xlu1 %679, %v32_v20   ;;  %v37_v20 = vld [vmem:[%s1014_s3] sm:$0x3] }
  0xc0   :  { %v191_v36 = vpop.permute.xlu2 %190 }
  0xc5   :  { %v41_v21 = vpop.permute.xlu1 %40 }
  0xc6   :  { %v79_v37 = vmul.f32 %v826_v25, %v41_v21  ;;  %v234_v25 = vld [vmem:[%s1012_s1 + $0x8] sm:$0xff] }
  0xc8   :  { %v128_v43 = vadd.f32 %v120_v35, %v79_v37  ;;  %v33_v35 = vld [vmem:[%s1014_s3 + $0x60] sm:$0xff] }
  0xc9   :  { %v29_v37 = vld [vmem:[%s1014_s3 + $0x40] sm:$0xff]  ;;  %417 = vperm.xlu2 %677, %v33_v35  }
  0xca   :  { %v177_v47 = vadd.f32 %v169_v44, %v128_v43  ;;  %397 = vperm.xlu1 %679, %v29_v37   ;;  %v354_v43 = vld [vmem:[%s1012_s1 + $0x78] sm:$0xff]  ;;  %v347_v44 = vld [vmem:[%s1012_s1 + $0x40] sm:$0xff] }
  0xce   :  { %v142_v27 = vpop.permute.xlu1 %141 }
  0xcf   :  { %v170_v29 = vmul.f32 %v834_v30, %v142_v27  ;;  %v235_v30 = vld [vmem:[%s1012_s1 + $0x10] sm:$0xff] }
  0xd1   :  { %v178_v34 = vadd.f32 %v170_v29, %v129_v33 }
  0xd2   :  { %384 = vperm.xlu1 %679, %v767_v5   ;;  %v349_v5 = vld [vmem:[%s1012_s1 + $0x50] sm:$0xff] }
  0xd3   :  { %v218_v41 = vadd.f32 %v191_v36, %v178_v34 }
  0xd5   :  { %v226_v46 = vmax.f32 %v218_v41, 0.0 }
  0xd7   :  { %v195_v40 = vpop.permute.xlu1 %194 }
  0xd8   :  { %v219_v42 = vadd.f32 %v195_v40, %v179_v38  ;;  %v30_v40 = vld [vmem:[%s1014_s3 + $0x48] sm:$0xff] }
  0xd9   :  { %402 = vperm.xlu0 %678, %v30_v40  }
  0xda   :  { %v227_v45 = vmax.f32 %v219_v42, 0.0  ;;  %372 = vperm.xlu1 %679, %v792_v9   ;;  %v351_v9 = vld [vmem:[%s1012_s1 + $0x60] sm:$0xff] }
  0xdc   :  { %311 = vmatpush.msra.mxu0 %v227_v45  ;;  %v31_v45 = vld [vmem:[%s1014_s3 + $0x50] sm:$0xff] }
  0xdd   :  { %407 = vperm.xlu2 %677, %v31_v45  }
  0xde   :  { %312 = vmatpush.msra.mxu0 %v226_v46  ;;  %v355_v46 = vld [vmem:[%s1012_s1 + $0x80] sm:$0xff] }
  0xdf   :  { %v187_v48 = vpop.permute.xlu1 %186 }
  0xe0   :  { %v217_v49 = vadd.f32 %v187_v48, %v177_v47  ;;  %v271_v62 = vpop.permute.xlu2 %270  ;;  %v348_v47 = vld [vmem:[%s1012_s1 + $0x48] sm:$0xff] }
  0xe1   :  { %388 = vperm.xlu0 %678, %v754_v1   ;;  %v356_v1 = vld [vmem:[%s1012_s1 + $0x88] sm:$0xff] }
  0xe2   :  { %v225_v50 = vmax.f32 %v217_v49, 0.0  ;;  %v360_v48 = vld [vmem:[%s1012_s1 + $0xa8] sm:$0xff]  ;;  %v353_v49 = vld [vmem:[%s1012_s1 + $0x70] sm:$0xff]  ;;  %680 = vset.pattern.permute.xlu1 %v719_v24 }
  0xe3   :  { %567 = vperm.xlu1 %680, %v37_v20  }
  0xe4   :  { %313 = vmatpush.msra.mxu0 %v225_v50  ;;  %v361_v50 = vld [vmem:[%s1012_s1 + $0xb0] sm:$0xff] }
  0xe5   :  { %610 = vmatmul.msk.f32.vlgmr.msra.gmra.mxu0 %vm273_vm0, %v233_v22  ;;  %392 = vperm.xlu2 %677, %v749_v0   ;;  %v357_v0 = vld [vmem:[%s1012_s1 + $0x90] sm:$0xff]  ;;  %v362_v22 = vld [vmem:[%s1012_s1 + $0xb8] sm:$0xff] }
  0xe8   :  { %v259_v6 = vpop.permute.xlu2 %258 }
  0xe9   :  { %376 = vperm.xlu0 %678, %v778_v7   ;;  %v350_v7 = vld [vmem:[%s1012_s1 + $0x58] sm:$0xff] }
  0xed   :  { %611 = vmatmul.msk.f32.gmra.mxu0 %vm273_vm0, %v234_v25  ;;  %380 = vperm.xlu2 %677, %v762_v4   ;;  %v358_v4 = vld [vmem:[%s1012_s1 + $0x98] sm:$0xff] }
  0xf0   :  { %v251_v26 = vpop.permute.xlu2 %250 }
  0xf1   :  { %364 = vperm.xlu0 %678, %v797_v10   ;;  %v359_v10 = vld [vmem:[%s1012_s1 + $0xa0] sm:$0xff] }
  0xf5   :  { %612 = vmatmul.msk.f32.gmra.mxu0 %vm273_vm0, %v235_v30  ;;  %368 = vperm.xlu2 %677, %v805_v11   ;;  %v352_v11 = vld [vmem:[%s1012_s1 + $0x68] sm:$0xff] }
  0xf6   :  { %v263_v2 = vpop.permute.xlu1 %262  ;;  %v267_v12 = vpop.permute.xlu0 %266 }
  0xf9   :  { %681 = vset.pattern.permute.xlu0 %v719_v24 }
  0xfd   :  { %613 = vmatmul.msk.f32.gmra.mxu0 %vm273_vm0, %v236_v51 }
  0xfe   :  { %v255_v13 = vpop.permute.xlu1 %254  ;;  %v247_v29 = vpop.permute.xlu0 %246 }
 0x105   :  { %614 = vmatmul.msk.f32.gmra.mxu0 %vm273_vm0, %v237_v52 }
 0x106   :  { %v243_v33 = vpop.permute.xlu1 %242 }
 0x10d   :  { %615 = vmatmul.msk.f32.gmra.mxu0 %vm273_vm0, %v238_v53 }
 0x115   :  { %616 = vmatmul.msk.f32.gmra.mxu0 %vm273_vm0, %v239_v54 }
 0x11d   :  { %617 = vmatmul.msk.f32.gmra.mxu0 %vm273_vm0, %v240_v55 }
 0x129   :  { %v428_v63 = vpop.permute.xlu0 %427 }
 0x162   :  { %v315_v56 = vpop.f32.mrf.mxu0 }
 0x163   :  { %v316_v38 = vadd.f32 %v315_v56, %v243_v33 }
 0x165   :  { %v339_v42 = vmax.f32 %v316_v38, 0.0 }
 0x16a   :  { %v318_v57 = vpop.f32.mrf.mxu0 }
 0x16b   :  { %v319_v34 = vadd.f32 %v318_v57, %v247_v29  ;;  %v433_v57 = vpop.permute.xlu2 %432 }
 0x16d   :  { %v340_v41 = vmax.f32 %v319_v34, 0.0 }
 0x172   :  { %v321_v58 = vpop.f32.mrf.mxu0 }
 0x173   :  { %v322_v31 = vadd.f32 %v321_v58, %v251_v26 }
 0x175   :  { %v341_v39 = vmax.f32 %v322_v31, 0.0 }
 0x17a   :  { %v324_v59 = vpop.f32.mrf.mxu0 }
 0x17b   :  { %v325_v27 = vadd.f32 %v324_v59, %v255_v13  ;;  %v423_v59 = vpop.permute.xlu1 %422 }
 0x17d   :  { %v342_v36 = vmax.f32 %v325_v27, 0.0 }
 0x182   :  { %v327_v60 = vpop.f32.mrf.mxu0 }
 0x183   :  { %v328_v21 = vadd.f32 %v327_v60, %v259_v6 }
 0x185   :  { %v343_v32 = vmax.f32 %v328_v21, 0.0 }
 0x18a   :  { %v330_v61 = vpop.f32.mrf.mxu0 }
 0x18b   :  { %v331_v17 = vadd.f32 %v330_v61, %v263_v2 }
 0x18d   :  { %v344_v28 = vmax.f32 %v331_v17, 0.0 }
 0x192   :  { %v333_v3 = vpop.f32.mrf.mxu0 }
 0x193   :  { %v334_v15 = vadd.f32 %v333_v3, %v267_v12  ;;  %v413_v3 = vpop.permute.xlu1 %412  ;;  %v403_v12 = vpop.permute.xlu0 %402 }
 0x195   :  { %v345_v23 = vmax.f32 %v334_v15, 0.0 }
 0x19a   :  { %v336_v14 = vpop.f32.mrf.mxu0 }
 0x19b   :  { %v337_v16 = vadd.f32 %v336_v14, %v271_v62  ;;  %v418_v62 = vpop.permute.xlu2 %417  ;;  %v389_v27 = vpop.permute.xlu0 %388 }
 0x19d   :  { %v346_v18 = vmax.f32 %v337_v16, 0.0 }
 0x19f   :  { %491 = vmatpush.msra.mxu1 %v346_v18  ;;  %634 = vmatpush.msra.mxu3 %v346_v18  ;;  %v398_v18 = vpop.permute.xlu1 %397 }
 0x1a1   :  { %492 = vmatpush.msra.mxu1 %v345_v23  ;;  %635 = vmatpush.msra.mxu3 %v345_v23 }
 0x1a3   :  { %493 = vmatpush.msra.mxu1 %v344_v28  ;;  %636 = vmatpush.msra.mxu3 %v344_v28  ;;  %v408_v8 = vpop.permute.xlu2 %407 }
 0x1a5   :  { %494 = vmatpush.msra.mxu1 %v343_v32  ;;  %637 = vmatpush.msra.mxu3 %v343_v32 }
 0x1a7   :  { %495 = vmatpush.msra.mxu1 %v342_v36  ;;  %638 = vmatpush.msra.mxu3 %v342_v36  ;;  %v385_v36 = vpop.permute.xlu1 %384 }
 0x1a9   :  { %496 = vmatpush.msra.mxu1 %v341_v39  ;;  %639 = vmatpush.msra.mxu3 %v341_v39 }
 0x1ab   :  { %497 = vmatpush.msra.mxu1 %v340_v41  ;;  %640 = vmatpush.msra.mxu3 %v340_v41  ;;  %v393_v26 = vpop.permute.xlu2 %392 }
 0x1ad   :  { %498 = vmatpush.msra.mxu1 %v339_v42  ;;  %641 = vmatpush.msra.mxu3 %v339_v42  ;;  %v377_v42 = vpop.permute.xlu0 %376 }
 0x1ae   :  { %625 = vmatmul.msk.f32.vlgmr.msra.gmra.mxu3 %vm273_vm0, %v354_v43  ;;  %618 = vmatmul.msk.f32.vlgmr.msra.gmra.mxu1 %vm273_vm0, %v347_v44 }
 0x1b3   :  { %v381_v38 = vpop.permute.xlu2 %380 }
 0x1b6   :  { %626 = vmatmul.msk.f32.gmra.mxu3 %vm273_vm0, %v355_v46  ;;  %619 = vmatmul.msk.f32.gmra.mxu1 %vm273_vm0, %v348_v47 }
 0x1be   :  { %627 = vmatmul.msk.f32.gmra.mxu3 %vm273_vm0, %v356_v1  ;;  %620 = vmatmul.msk.f32.gmra.mxu1 %vm273_vm0, %v349_v5  ;;  %v373_v5 = vpop.permute.xlu1 %372 }
 0x1c6   :  { %628 = vmatmul.msk.f32.gmra.mxu3 %vm273_vm0, %v357_v0  ;;  %621 = vmatmul.msk.f32.gmra.mxu1 %vm273_vm0, %v350_v7 }
 0x1ce   :  { %629 = vmatmul.msk.f32.gmra.mxu3 %vm273_vm0, %v358_v4  ;;  %622 = vmatmul.msk.f32.gmra.mxu1 %vm273_vm0, %v351_v9  ;;  %v369_v4 = vpop.permute.xlu2 %368 }
 0x1d6   :  { %630 = vmatmul.msk.f32.gmra.mxu3 %vm273_vm0, %v359_v10  ;;  %623 = vmatmul.msk.f32.gmra.mxu1 %vm273_vm0, %v352_v11  ;;  %v365_v11 = vpop.permute.xlu0 %364 }
 0x1de   :  { %631 = vmatmul.msk.f32.gmra.mxu3 %vm273_vm0, %v360_v48  ;;  %624 = vmatmul.msk.f32.gmra.mxu1 %vm273_vm0, %v353_v49 }
 0x1e6   :  { %632 = vmatmul.msk.f32.gmra.mxu3 %vm273_vm0, %v361_v50 }
 0x1ee   :  { %633 = vmatmul.msk.f32.gmra.mxu3 %vm273_vm0, %v362_v22 }
 0x22b   :  { %v993_v52 = vpop.f32.mrf.mxu1 }
 0x22c   :  { %v501_v50 = vadd.f32 %v993_v52, %v365_v11 }
 0x231   :  { %v521_v25 = vpop.f32.mrf.mxu3 }
 0x232   :  { %v522_v40 = vadd.f32 %v521_v25, %v393_v26 }
 0x233   :  { %v995_v54 = vpop.f32.mrf.mxu1 }
 0x234   :  { %v555_v45 = vmax.f32 %v522_v40, 0.0  ;;  %v504_v49 = vadd.f32 %v995_v54, %v369_v4 }
 0x236   :  { %v549_v25 = vmax.f32 %v504_v49, 0.0 }
 0x239   :  { %v524_v30 = vpop.f32.mrf.mxu3 }
 0x23a   :  { %v525_v35 = vadd.f32 %v524_v30, %v398_v18  ;;  %v548_v30 = vmax.f32 %v501_v50, 0.0 }
 0x23b   :  { %v997_v56 = vpop.f32.mrf.mxu1 }
 0x23c   :  { %v556_v43 = vmax.f32 %v525_v35, 0.0  ;;  %v507_v10 = vadd.f32 %v997_v56, %v373_v5 }
 0x23e   :  { %v550_v22 = vmax.f32 %v507_v10, 0.0 }
 0x241   :  { %v527_v51 = vpop.f32.mrf.mxu3 }
 0x242   :  { %v528_v33 = vadd.f32 %v527_v51, %v403_v12  ;;  %v564_v51 = vld [vmem:[%s1013_s2] sm:$0x3] }
 0x243   :  { %v509_v60 = vpop.f32.mrf.mxu1 }
 0x244   :  { %v557_v41 = vmax.f32 %v528_v33, 0.0  ;;  %v510_v0 = vadd.f32 %v509_v60, %v377_v42 }
 0x246   :  { %v551_v48 = vmax.f32 %v510_v0, 0.0 }
 0x249   :  { %v530_v53 = vpop.f32.mrf.mxu3 }
 0x24a   :  { %v531_v31 = vadd.f32 %v530_v53, %v408_v8  ;;  %v568_v53 = vpop.permute.xlu1 %567 }
 0x24b   :  { %v512_v6 = vpop.f32.mrf.mxu1 }
 0x24c   :  { %v558_v37 = vmax.f32 %v531_v31, 0.0  ;;  %v513_v47 = vadd.f32 %v512_v6, %v381_v38 }
 0x24e   :  { %v552_v9 = vmax.f32 %v513_v47, 0.0 }
 0x251   :  { %v533_v55 = vpop.f32.mrf.mxu3 }
 0x252   :  { %v534_v28 = vadd.f32 %v533_v55, %v413_v3 }
 0x253   :  { %v515_v19 = vpop.f32.mrf.mxu1 }
 0x254   :  { %v559_v34 = vmax.f32 %v534_v28, 0.0  ;;  %v516_v46 = vadd.f32 %v515_v19, %v385_v36 }
 0x256   :  { %v553_v7 = vmax.f32 %v516_v46, 0.0 }
 0x259   :  { %v536_v58 = vpop.f32.mrf.mxu3 }
 0x25a   :  { %v537_v21 = vadd.f32 %v536_v58, %v418_v62 }
 0x25b   :  { %v518_v39 = vpop.f32.mrf.mxu1 }
 0x25c   :  { %v560_v32 = vmax.f32 %v537_v21, 0.0  ;;  %v519_v44 = vadd.f32 %v518_v39, %v389_v27 }
 0x25e   :  { %v554_v1 = vmax.f32 %v519_v44, 0.0 }
 0x261   :  { %v539_v61 = vpop.f32.mrf.mxu3 }
 0x262   :  { %v540_v16 = vadd.f32 %v539_v61, %v423_v59 }
 0x264   :  { %v561_v29 = vmax.f32 %v540_v16, 0.0 }
 0x269   :  { %v542_v2 = vpop.f32.mrf.mxu3 }
 0x26a   :  { %v543_v14 = vadd.f32 %v542_v2, %v428_v63 }
 0x26c   :  { %v562_v23 = vmax.f32 %v543_v14, 0.0 }
 0x271   :  { %v545_v13 = vpop.f32.mrf.mxu3 }
 0x272   :  { %v546_v15 = vadd.f32 %v545_v13, %v433_v57 }
 0x274   :  { %v563_v17 = vmax.f32 %v546_v15, 0.0 }
 0x276   :  { %570 = vmatpush.msra.mxu2 %v563_v17 }
 0x278   :  { %571 = vmatpush.msra.mxu2 %v562_v23 }
 0x27a   :  { %572 = vmatpush.msra.mxu2 %v561_v29 }
 0x27c   :  { %573 = vmatpush.msra.mxu2 %v560_v32 }
 0x27e   :  { %574 = vmatpush.msra.mxu2 %v559_v34 }
 0x280   :  { %575 = vmatpush.msra.mxu2 %v558_v37 }
 0x282   :  { %576 = vmatpush.msra.mxu2 %v557_v41 }
 0x284   :  { %577 = vmatpush.msra.mxu2 %v556_v43 }
 0x286   :  { %578 = vmatpush.msra.mxu2 %v555_v45 }
 0x288   :  { %579 = vmatpush.msra.mxu2 %v554_v1 }
 0x28a   :  { %580 = vmatpush.msra.mxu2 %v553_v7 }
 0x28c   :  { %581 = vmatpush.msra.mxu2 %v552_v9 }
 0x28e   :  { %582 = vmatpush.msra.mxu2 %v551_v48 }
 0x290   :  { %583 = vmatpush.msra.mxu2 %v550_v22 }
 0x292   :  { %584 = vmatpush.msra.mxu2 %v549_v25 }
 0x294   :  { %585 = vmatpush.msra.mxu2 %v548_v30 }
 0x295   :  { %586 = vmatmul.f32.vlgmr.msra.gmra.mxu2 %v564_v51 }
 0x318   :  { %v587_v55 = vpop.f32.mrf.mxu2 }
 0x319   :  { %v588_v56 = vadd.f32 %v587_v55, %v568_v53 }
 0x31b   :  { %590 = vst [vmem:[#allocation2] sm:$0x1] %v588_v56  ;;  %v591_v54 = vmul.f32 1.442695, %v588_v56 }
 0x31d   :  { %685 = vpow2.f32 %v591_v54 }
 0x323   :  { %v686_v52 = vpop.eup %685 }
 0x324   :  { %593 = vst [vmem:[#allocation2] sm:$0x2] %v686_v52 }
 0x325   :  { %604 = dma.vmem_to_hbm [thread:$0]  %s600_s23, 32, %s602_s26, [#allocation3]  }
 0x326   :  { %711 = dma.done.wait [#allocation3], 32  }
 0x327   :  { %712 = vsyncadd [#allocation3], 4294967264 }
 0x328   :  { %609 = vsyncpa [#allocation3], 1 }

</bundles_post_ra>
